<compile_context>
chip_gen: v6e
topology: v6e:2x2x1
jax: 0.10.0
libtpu: 0.0.40
codegen_flags: <defaults>
</compile_context>

<pallas_src>
import functools
import numpy as np
import jax
import jax.numpy as jnp
from jax import lax
from jax.experimental import pallas as pl
from jax.experimental.pallas import tpu as pltpu


# ----------------------------------------------------------------------------
# PyTorch F.interpolate(mode='nearest') source-index map: src = min(floor(dst*in/out), in-1)
def _nearest_src_index(in_size, out_size):
    scale = in_size / out_size
    return np.minimum((np.arange(out_size) * scale).astype(np.int64), in_size - 1)


# ----------------------------------------------------------------- kernels ---
def _upsample_conv_kernel(idx_m1_ref, idx_0_ref, idx_p1_ref,   # scalar prefetch (used in index_maps)
                          xm1_ref, x0_ref, xp1_ref,            # (1,1,C,W) gathered source rows
                          sw_ref,                              # (3, W, Wout) one-hot width maps per kw
                          w_ref,                               # (3, 3, C, C) conv weights [kh, kw]
                          b_ref,                               # (C, 1) bias
                          o_ref):                              # (1, 1, C, Wout)
    del idx_m1_ref, idx_0_ref, idx_p1_ref
    f32 = jnp.float32
    ho = pl.program_id(1)
    n_ho = pl.num_programs(1)

    # Height zero-padding of the (virtual) upsampled image: neighbour rows vanish at borders.
    top = jnp.where(ho > 0, f32(1.0), f32(0.0))
    bot = jnp.where(ho < n_ho - 1, f32(1.0), f32(0.0))
    rows = (xm1_ref[0, 0] * top,        # upsampled row ho-1  (source row src_h[ho-1])
            x0_ref[0, 0],               # upsampled row ho
            xp1_ref[0, 0] * bot)        # upsampled row ho+1

    C, Wout = o_ref.shape[2], o_ref.shape[3]
    acc = jnp.zeros((C, Wout), f32) + b_ref[...]          # bias broadcast (C, Wout)

    # out = sum_kw ( sum_kh W[kh,kw] @ row_kh ) @ Sw_kw   -- 9 + 3 MXU matmuls, no transposes
    for kw in range(3):
        a = jnp.zeros(rows[0].shape, f32)
        for kh in range(3):
            a = a + jnp.dot(w_ref[kh, kw], rows[kh],
                            preferred_element_type=jnp.float32)          # (C, W)
        acc = acc + jnp.dot(a, sw_ref[kw],
                            preferred_element_type=jnp.float32)          # (C, Wout)

    o_ref[0, 0] = acc.astype(o_ref.dtype)


def _upsample_only_kernel(idx_0_ref, x_ref, sw_ref, o_ref):
    del idx_0_ref
    # Pure nearest upsample: gathered source row (C, W) times one-hot width map (W, Wout).
    o_ref[0, 0] = jnp.dot(x_ref[0, 0], sw_ref[...],
                          preferred_element_type=jnp.float32).astype(o_ref.dtype)


# ----------------------------------------------------------------- wrapper ---
def upsample(x, size, *, use_conv, conv_w=None, conv_b=None):
    B, C, H, W = x.shape
    Hout, Wout = size
    src_h = _nearest_src_index(H, Hout).astype(np.int32)
    src_w = _nearest_src_index(W, Wout)

    # (B, H, C, W): channels on sublanes, W on lanes; one source row per grid step.
    x_r = jnp.transpose(x, (0, 2, 1, 3)).astype(jnp.float32)
    grid = (B, Hout)

    # VMEM budget from actual block footprint (double-buffered streams + resident consts).
    elt = 4
    blocks = 2 * (3 * C * W + C * Wout) * elt
    consts = (3 * W * Wout + 9 * C * C + C) * elt
    vmem_bytes = int(min(64 * 1024 * 1024, max(4 * 1024 * 1024, 2 * (blocks + consts))))

    if use_conv:
        # Source rows feeding the three upsampled rows ho-1, ho, ho+1 (borders masked in-kernel).
        idx_0 = jnp.asarray(src_h, jnp.int32)
        idx_m1 = jnp.asarray(np.concatenate([[0], src_h[:-1]]).astype(np.int32))
        idx_p1 = jnp.asarray(np.concatenate([src_h[1:], [0]]).astype(np.int32))

        # One-hot width replication + zero-pad maps, one per conv column kw.
        sw = np.zeros((3, W, Wout), np.float32)
        for kw in range(3):
            for wo in range(Wout):
                j = wo + kw                       # column in the zero-padded upsampled image
                if 1 <= j <= Wout:
                    sw[kw, src_w[j - 1], wo] = 1.0
        sw = jnp.asarray(sw)

        w_k = jnp.transpose(conv_w, (2, 3, 0, 1)).astype(jnp.float32)    # (3, 3, Cout, Cin)
        b_k = conv_b.reshape(C, 1).astype(jnp.float32)

        def xm1_map(b, ho, im1, i0, ip1): return (b, im1[ho], 0, 0)
        def x0_map(b, ho, im1, i0, ip1):  return (b, i0[ho], 0, 0)
        def xp1_map(b, ho, im1, i0, ip1): return (b, ip1[ho], 0, 0)
        def sw_map(b, ho, *_):  return (0, 0, 0)
        def w_map(b, ho, *_):   return (0, 0, 0, 0)
        def b_map(b, ho, *_):   return (0, 0)
        def out_map(b, ho, *_): return (b, ho, 0, 0)

        out = pl.pallas_call(
            _upsample_conv_kernel,
            out_shape=jax.ShapeDtypeStruct((B, Hout, C, Wout), jnp.float32),
            grid_spec=pltpu.PrefetchScalarGridSpec(
                num_scalar_prefetch=3,
                grid=grid,
                in_specs=[
                    pl.BlockSpec((1, 1, C, W), xm1_map),
                    pl.BlockSpec((1, 1, C, W), x0_map),
                    pl.BlockSpec((1, 1, C, W), xp1_map),
                    pl.BlockSpec((3, W, Wout), sw_map),
                    pl.BlockSpec((3, 3, C, C), w_map),
                    pl.BlockSpec((C, 1), b_map),
                ],
                out_specs=pl.BlockSpec((1, 1, C, Wout), out_map),
            ),
            compiler_params=pltpu.CompilerParams(
                dimension_semantics=("parallel", "parallel"),
                vmem_limit_bytes=vmem_bytes),
        )(idx_m1, idx_0, idx_p1, x_r, x_r, x_r, sw, w_k, b_k)
    else:
        idx_0 = jnp.asarray(src_h, jnp.int32)
        sw = np.zeros((W, Wout), np.float32)
        sw[src_w, np.arange(Wout)] = 1.0
        sw = jnp.asarray(sw)

        out = pl.pallas_call(
            _upsample_only_kernel,
            out_shape=jax.ShapeDtypeStruct((B, Hout, C, Wout), jnp.float32),
            grid_spec=pltpu.PrefetchScalarGridSpec(
                num_scalar_prefetch=1,
                grid=grid,
                in_specs=[
                    pl.BlockSpec((1, 1, C, W), lambda b, ho, i0: (b, i0[ho], 0, 0)),
                    pl.BlockSpec((W, Wout), lambda b, ho, i0: (0, 0)),
                ],
                out_specs=pl.BlockSpec((1, 1, C, Wout),
                                       lambda b, ho, i0: (b, ho, 0, 0)),
            ),
            compiler_params=pltpu.CompilerParams(
                dimension_semantics=("parallel", "parallel"),
                vmem_limit_bytes=vmem_bytes),
        )(idx_0, x_r, sw)

    # back to NCHW
    return jnp.transpose(out, (0, 2, 1, 3))


# ---------------------------------------------------- pure-JAX reference -----
def upsample_ref(x, size, *, use_conv, conv_w=None, conv_b=None):
    B, C, H, W = x.shape
    Hout, Wout = size
    src_h = _nearest_src_index(H, Hout)
    src_w = _nearest_src_index(W, Wout)
    up = x[:, :, src_h, :][:, :, :, src_w]
    if use_conv:
        up = lax.conv_general_dilated(
            up, conv_w, window_strides=(1, 1), padding=((1, 1), (1, 1)),
            dimension_numbers=("NCHW", "OIHW", "NCHW"),
            precision=lax.Precision.HIGHEST) + conv_b[None, :, None, None]
    return up


# ------------------------------------------------------------------- main ----
if __name__ == "__main__":
    B, C, H, W = 2, 4, 16, 16
    size = (32, 32)                    # integer 2x upsample, use_conv=True path

    key = jax.random.PRNGKey(0)
    k1, k2, k3 = jax.random.split(key, 3)
    x = jax.random.normal(k1, (B, C, H, W), jnp.float32)
    conv_w = 0.2 * jax.random.normal(k2, (C, C, 3, 3), jnp.float32)
    conv_b = 0.1 * jax.random.normal(k3, (C,), jnp.float32)

    out = jax.block_until_ready(
        upsample(x, size, use_conv=True, conv_w=conv_w, conv_b=conv_b))
    ref = jax.block_until_ready(
        upsample_ref(x, size, use_conv=True, conv_w=conv_w, conv_b=conv_b))
    np.testing.assert_allclose(np.asarray(out), np.asarray(ref), rtol=1e-4, atol=1e-4)

    # Non-integer scale + use_conv=False path (pure nearest resize).
    size2 = (24, 20)
    out2 = jax.block_until_ready(upsample(x, size2, use_conv=False))
    ref2 = jax.block_until_ready(upsample_ref(x, size2, use_conv=False))
    np.testing.assert_allclose(np.asarray(out2), np.asarray(ref2), rtol=1e-6, atol=1e-6)

    print("KERNEL_OK")
</pallas_src>

<mosaic_0001>
module attributes {stable_mosaic.version = 11 : i64} {
  func.func @_upsample_conv_kernel(%arg0: i32, %arg1: i32, %arg2: memref<32xi32, #tpu.memory_space<smem>>, %arg3: memref<32xi32, #tpu.memory_space<smem>>, %arg4: memref<32xi32, #tpu.memory_space<smem>>, %arg5: memref<1x1x4x16xf32, #tpu.memory_space<vmem>>, %arg6: memref<1x1x4x16xf32, #tpu.memory_space<vmem>>, %arg7: memref<1x1x4x16xf32, #tpu.memory_space<vmem>>, %arg8: memref<3x16x32xf32, #tpu.memory_space<vmem>>, %arg9: memref<3x3x4x4xf32, #tpu.memory_space<vmem>>, %arg10: memref<4x1xf32, #tpu.memory_space<vmem>>, %arg11: memref<1x1x4x32xf32, #tpu.memory_space<vmem>>) attributes {dimension_semantics = [#tpu.dimension_semantics<parallel>, #tpu.dimension_semantics<parallel>], iteration_bounds = array<i64: 2, 32>, scalar_prefetch = 3 : i64, scratch_operands = 0 : i64, tpu.core_type = #tpu.core_type<tc>, window_params = [{transform_indices = @transform_0, window_bounds = array<i64: 1, 1, 4, 16>}, {transform_indices = @transform_1, window_bounds = array<i64: 1, 1, 4, 16>}, {transform_indices = @transform_2, window_bounds = array<i64: 1, 1, 4, 16>}, {pipeline_mode = #tpu.pipeline_mode<synchronous>, transform_indices = @transform_3, window_bounds = array<i64: 3, 16, 32>}, {pipeline_mode = #tpu.pipeline_mode<synchronous>, transform_indices = @transform_4, window_bounds = array<i64: 3, 3, 4, 4>}, {pipeline_mode = #tpu.pipeline_mode<synchronous>, transform_indices = @transform_5, window_bounds = array<i64: 4, 1>}, {transform_indices = @transform_6, window_bounds = array<i64: 1, 1, 4, 32>}]} {
    %c0_i32 = arith.constant 0 : i32
    %0 = arith.cmpi sgt, %arg1, %c0_i32 : i32
    %cst = arith.constant 1.000000e+00 : f32
    %cst_0 = arith.constant 0.000000e+00 : f32
    %1 = arith.select %0, %cst, %cst_0 : f32
    %c31_i32 = arith.constant 31 : i32
    %2 = arith.cmpi slt, %arg1, %c31_i32 : i32
    %cst_1 = arith.constant 1.000000e+00 : f32
    %cst_2 = arith.constant 0.000000e+00 : f32
    %3 = arith.select %2, %cst_1, %cst_2 : f32
    %c0 = arith.constant 0 : index
    %c0_3 = arith.constant 0 : index
    %c0_4 = arith.constant 0 : index
    %c0_5 = arith.constant 0 : index
    %4 = vector.load %arg5[%c0, %c0_3, %c0_4, %c0_5] : memref<1x1x4x16xf32, #tpu.memory_space<vmem>>, vector<1x1x4x16xf32>
    %5 = vector.shape_cast %4 : vector<1x1x4x16xf32> to vector<4x16xf32>
    %6 = vector.broadcast %1 : f32 to vector<4x16xf32>
    %7 = arith.mulf %5, %6 : vector<4x16xf32>
    %c0_6 = arith.constant 0 : index
    %c0_7 = arith.constant 0 : index
    %c0_8 = arith.constant 0 : index
    %c0_9 = arith.constant 0 : index
    %8 = vector.load %arg6[%c0_6, %c0_7, %c0_8, %c0_9] : memref<1x1x4x16xf32, #tpu.memory_space<vmem>>, vector<1x1x4x16xf32>
    %9 = vector.shape_cast %8 : vector<1x1x4x16xf32> to vector<4x16xf32>
    %c0_10 = arith.constant 0 : index
    %c0_11 = arith.constant 0 : index
    %c0_12 = arith.constant 0 : index
    %c0_13 = arith.constant 0 : index
    %10 = vector.load %arg7[%c0_10, %c0_11, %c0_12, %c0_13] : memref<1x1x4x16xf32, #tpu.memory_space<vmem>>, vector<1x1x4x16xf32>
    %11 = vector.shape_cast %10 : vector<1x1x4x16xf32> to vector<4x16xf32>
    %12 = vector.broadcast %3 : f32 to vector<4x16xf32>
    %13 = arith.mulf %11, %12 : vector<4x16xf32>
    %cst_14 = arith.constant 0.000000e+00 : f32
    %14 = vector.broadcast %cst_14 : f32 to vector<4x32xf32>
    %c0_15 = arith.constant 0 : index
    %c0_16 = arith.constant 0 : index
    %15 = vector.load %arg10[%c0_15, %c0_16] : memref<4x1xf32, #tpu.memory_space<vmem>>, vector<4x1xf32>
    %16 = vector.broadcast %15 : vector<4x1xf32> to vector<4x32xf32>
    %17 = arith.addf %14, %16 : vector<4x32xf32>
    %cst_17 = arith.constant 0.000000e+00 : f32
    %18 = vector.broadcast %cst_17 : f32 to vector<4x16xf32>
    %c0_18 = arith.constant 0 : index
    %c0_19 = arith.constant 0 : index
    %c0_20 = arith.constant 0 : index
    %c0_21 = arith.constant 0 : index
    %19 = vector.load %arg9[%c0_18, %c0_19, %c0_20, %c0_21] : memref<3x3x4x4xf32, #tpu.memory_space<vmem>>, vector<1x1x4x4xf32>
    %20 = vector.shape_cast %19 : vector<1x1x4x4xf32> to vector<4x4xf32>
    %cst_22 = arith.constant dense<0.000000e+00> : vector<4x16xf32>
    %21 = tpu.matmul %20, %7, %cst_22 {dimension_numbers = #tpu.dot_dimension_numbers<[1], [0], [0], [1], [0, 0, 1, 1], [], []>} : vector<4x4xf32>, vector<4x16xf32>, vector<4x16xf32> -> vector<4x16xf32>
    %22 = arith.addf %18, %21 : vector<4x16xf32>
    %c1 = arith.constant 1 : index
    %c0_23 = arith.constant 0 : index
    %c0_24 = arith.constant 0 : index
    %c0_25 = arith.constant 0 : index
    %23 = vector.load %arg9[%c1, %c0_23, %c0_24, %c0_25] : memref<3x3x4x4xf32, #tpu.memory_space<vmem>>, vector<1x1x4x4xf32>
    %24 = vector.shape_cast %23 : vector<1x1x4x4xf32> to vector<4x4xf32>
    %cst_26 = arith.constant dense<0.000000e+00> : vector<4x16xf32>
    %25 = tpu.matmul %24, %9, %cst_26 {dimension_numbers = #tpu.dot_dimension_numbers<[1], [0], [0], [1], [0, 0, 1, 1], [], []>} : vector<4x4xf32>, vector<4x16xf32>, vector<4x16xf32> -> vector<4x16xf32>
    %26 = arith.addf %22, %25 : vector<4x16xf32>
    %c2 = arith.constant 2 : index
    %c0_27 = arith.constant 0 : index
    %c0_28 = arith.constant 0 : index
    %c0_29 = arith.constant 0 : index
    %27 = vector.load %arg9[%c2, %c0_27, %c0_28, %c0_29] : memref<3x3x4x4xf32, #tpu.memory_space<vmem>>, vector<1x1x4x4xf32>
    %28 = vector.shape_cast %27 : vector<1x1x4x4xf32> to vector<4x4xf32>
    %cst_30 = arith.constant dense<0.000000e+00> : vector<4x16xf32>
    %29 = tpu.matmul %28, %13, %cst_30 {dimension_numbers = #tpu.dot_dimension_numbers<[1], [0], [0], [1], [0, 0, 1, 1], [], []>} : vector<4x4xf32>, vector<4x16xf32>, vector<4x16xf32> -> vector<4x16xf32>
    %30 = arith.addf %26, %29 : vector<4x16xf32>
    %c0_31 = arith.constant 0 : index
    %c0_32 = arith.constant 0 : index
    %c0_33 = arith.constant 0 : index
    %31 = vector.load %arg8[%c0_31, %c0_32, %c0_33] : memref<3x16x32xf32, #tpu.memory_space<vmem>>, vector<1x16x32xf32>
    %32 = vector.shape_cast %31 : vector<1x16x32xf32> to vector<16x32xf32>
    %cst_34 = arith.constant dense<0.000000e+00> : vector<4x32xf32>
    %33 = tpu.matmul %30, %32, %cst_34 {dimension_numbers = #tpu.dot_dimension_numbers<[1], [0], [0], [1], [0, 0, 1, 1], [], []>} : vector<4x16xf32>, vector<16x32xf32>, vector<4x32xf32> -> vector<4x32xf32>
    %34 = arith.addf %17, %33 : vector<4x32xf32>
    %cst_35 = arith.constant 0.000000e+00 : f32
    %35 = vector.broadcast %cst_35 : f32 to vector<4x16xf32>
    %c0_36 = arith.constant 0 : index
    %c1_37 = arith.constant 1 : index
    %c0_38 = arith.constant 0 : index
    %c0_39 = arith.constant 0 : index
    %36 = vector.load %arg9[%c0_36, %c1_37, %c0_38, %c0_39] : memref<3x3x4x4xf32, #tpu.memory_space<vmem>>, vector<1x1x4x4xf32>
    %37 = vector.shape_cast %36 : vector<1x1x4x4xf32> to vector<4x4xf32>
    %cst_40 = arith.constant dense<0.000000e+00> : vector<4x16xf32>
    %38 = tpu.matmul %37, %7, %cst_40 {dimension_numbers = #tpu.dot_dimension_numbers<[1], [0], [0], [1], [0, 0, 1, 1], [], []>} : vector<4x4xf32>, vector<4x16xf32>, vector<4x16xf32> -> vector<4x16xf32>
    %39 = arith.addf %35, %38 : vector<4x16xf32>
    %c1_41 = arith.constant 1 : index
    %c1_42 = arith.constant 1 : index
    %c0_43 = arith.constant 0 : index
    %c0_44 = arith.constant 0 : index
    %40 = vector.load %arg9[%c1_41, %c1_42, %c0_43, %c0_44] : memref<3x3x4x4xf32, #tpu.memory_space<vmem>>, vector<1x1x4x4xf32>
    %41 = vector.shape_cast %40 : vector<1x1x4x4xf32> to vector<4x4xf32>
    %cst_45 = arith.constant dense<0.000000e+00> : vector<4x16xf32>
    %42 = tpu.matmul %41, %9, %cst_45 {dimension_numbers = #tpu.dot_dimension_numbers<[1], [0], [0], [1], [0, 0, 1, 1], [], []>} : vector<4x4xf32>, vector<4x16xf32>, vector<4x16xf32> -> vector<4x16xf32>
    %43 = arith.addf %39, %42 : vector<4x16xf32>
    %c2_46 = arith.constant 2 : index
    %c1_47 = arith.constant 1 : index
    %c0_48 = arith.constant 0 : index
    %c0_49 = arith.constant 0 : index
    %44 = vector.load %arg9[%c2_46, %c1_47, %c0_48, %c0_49] : memref<3x3x4x4xf32, #tpu.memory_space<vmem>>, vector<1x1x4x4xf32>
    %45 = vector.shape_cast %44 : vector<1x1x4x4xf32> to vector<4x4xf32>
    %cst_50 = arith.constant dense<0.000000e+00> : vector<4x16xf32>
    %46 = tpu.matmul %45, %13, %cst_50 {dimension_numbers = #tpu.dot_dimension_numbers<[1], [0], [0], [1], [0, 0, 1, 1], [], []>} : vector<4x4xf32>, vector<4x16xf32>, vector<4x16xf32> -> vector<4x16xf32>
    %47 = arith.addf %43, %46 : vector<4x16xf32>
    %c1_51 = arith.constant 1 : index
    %c0_52 = arith.constant 0 : index
    %c0_53 = arith.constant 0 : index
    %48 = vector.load %arg8[%c1_51, %c0_52, %c0_53] : memref<3x16x32xf32, #tpu.memory_space<vmem>>, vector<1x16x32xf32>
    %49 = vector.shape_cast %48 : vector<1x16x32xf32> to vector<16x32xf32>
    %cst_54 = arith.constant dense<0.000000e+00> : vector<4x32xf32>
    %50 = tpu.matmul %47, %49, %cst_54 {dimension_numbers = #tpu.dot_dimension_numbers<[1], [0], [0], [1], [0, 0, 1, 1], [], []>} : vector<4x16xf32>, vector<16x32xf32>, vector<4x32xf32> -> vector<4x32xf32>
    %51 = arith.addf %34, %50 : vector<4x32xf32>
    %cst_55 = arith.constant 0.000000e+00 : f32
    %52 = vector.broadcast %cst_55 : f32 to vector<4x16xf32>
    %c0_56 = arith.constant 0 : index
    %c2_57 = arith.constant 2 : index
    %c0_58 = arith.constant 0 : index
    %c0_59 = arith.constant 0 : index
    %53 = vector.load %arg9[%c0_56, %c2_57, %c0_58, %c0_59] : memref<3x3x4x4xf32, #tpu.memory_space<vmem>>, vector<1x1x4x4xf32>
    %54 = vector.shape_cast %53 : vector<1x1x4x4xf32> to vector<4x4xf32>
    %cst_60 = arith.constant dense<0.000000e+00> : vector<4x16xf32>
    %55 = tpu.matmul %54, %7, %cst_60 {dimension_numbers = #tpu.dot_dimension_numbers<[1], [0], [0], [1], [0, 0, 1, 1], [], []>} : vector<4x4xf32>, vector<4x16xf32>, vector<4x16xf32> -> vector<4x16xf32>
    %56 = arith.addf %52, %55 : vector<4x16xf32>
    %c1_61 = arith.constant 1 : index
    %c2_62 = arith.constant 2 : index
    %c0_63 = arith.constant 0 : index
    %c0_64 = arith.constant 0 : index
    %57 = vector.load %arg9[%c1_61, %c2_62, %c0_63, %c0_64] : memref<3x3x4x4xf32, #tpu.memory_space<vmem>>, vector<1x1x4x4xf32>
    %58 = vector.shape_cast %57 : vector<1x1x4x4xf32> to vector<4x4xf32>
    %cst_65 = arith.constant dense<0.000000e+00> : vector<4x16xf32>
    %59 = tpu.matmul %58, %9, %cst_65 {dimension_numbers = #tpu.dot_dimension_numbers<[1], [0], [0], [1], [0, 0, 1, 1], [], []>} : vector<4x4xf32>, vector<4x16xf32>, vector<4x16xf32> -> vector<4x16xf32>
    %60 = arith.addf %56, %59 : vector<4x16xf32>
    %c2_66 = arith.constant 2 : index
    %c2_67 = arith.constant 2 : index
    %c0_68 = arith.constant 0 : index
    %c0_69 = arith.constant 0 : index
    %61 = vector.load %arg9[%c2_66, %c2_67, %c0_68, %c0_69] : memref<3x3x4x4xf32, #tpu.memory_space<vmem>>, vector<1x1x4x4xf32>
    %62 = vector.shape_cast %61 : vector<1x1x4x4xf32> to vector<4x4xf32>
    %cst_70 = arith.constant dense<0.000000e+00> : vector<4x16xf32>
    %63 = tpu.matmul %62, %13, %cst_70 {dimension_numbers = #tpu.dot_dimension_numbers<[1], [0], [0], [1], [0, 0, 1, 1], [], []>} : vector<4x4xf32>, vector<4x16xf32>, vector<4x16xf32> -> vector<4x16xf32>
    %64 = arith.addf %60, %63 : vector<4x16xf32>
    %c2_71 = arith.constant 2 : index
    %c0_72 = arith.constant 0 : index
    %c0_73 = arith.constant 0 : index
    %65 = vector.load %arg8[%c2_71, %c0_72, %c0_73] : memref<3x16x32xf32, #tpu.memory_space<vmem>>, vector<1x16x32xf32>
    %66 = vector.shape_cast %65 : vector<1x16x32xf32> to vector<16x32xf32>
    %cst_74 = arith.constant dense<0.000000e+00> : vector<4x32xf32>
    %67 = tpu.matmul %64, %66, %cst_74 {dimension_numbers = #tpu.dot_dimension_numbers<[1], [0], [0], [1], [0, 0, 1, 1], [], []>} : vector<4x16xf32>, vector<16x32xf32>, vector<4x32xf32> -> vector<4x32xf32>
    %68 = arith.addf %51, %67 : vector<4x32xf32>
    %c0_75 = arith.constant 0 : index
    %c0_76 = arith.constant 0 : index
    %c0_77 = arith.constant 0 : index
    %c0_78 = arith.constant 0 : index
    %69 = vector.load %arg11[%c0_75, %c0_76, %c0_77, %c0_78] : memref<1x1x4x32xf32, #tpu.memory_space<vmem>>, vector<1x1x4x32xf32>
    %70 = vector.shape_cast %69 : vector<1x1x4x32xf32> to vector<4x32xf32>
    %71 = vector.shape_cast %68 : vector<4x32xf32> to vector<1x1x4x32xf32>
    tpu.vector_store %arg11[%c0_75, %c0_76, %c0_77, %c0_78], %71 {strides = array<i32>} : memref<1x1x4x32xf32, #tpu.memory_space<vmem>>, vector<1x1x4x32xf32>,
    return
  }
  func.func @transform_0(%arg0: i32, %arg1: i32, %arg2: memref<32xi32, #tpu.memory_space<smem>>, %arg3: memref<32xi32, #tpu.memory_space<smem>>, %arg4: memref<32xi32, #tpu.memory_space<smem>>) -> (i32, i32, i32, i32) {
    %0 = arith.index_cast %arg1 : i32 to index
    %1 = memref.load %arg2[%0] : memref<32xi32, #tpu.memory_space<smem>>
    %c0_i32 = arith.constant 0 : i32
    %c0_i32_0 = arith.constant 0 : i32
    %c0_i32_1 = arith.constant 0 : i32
    return %arg0, %1, %c0_i32, %c0_i32_0 : i32, i32, i32, i32
  }
  func.func @transform_1(%arg0: i32, %arg1: i32, %arg2: memref<32xi32, #tpu.memory_space<smem>>, %arg3: memref<32xi32, #tpu.memory_space<smem>>, %arg4: memref<32xi32, #tpu.memory_space<smem>>) -> (i32, i32, i32, i32) {
    %0 = arith.index_cast %arg1 : i32 to index
    %1 = memref.load %arg3[%0] : memref<32xi32, #tpu.memory_space<smem>>
    %c0_i32 = arith.constant 0 : i32
    %c0_i32_0 = arith.constant 0 : i32
    %c0_i32_1 = arith.constant 0 : i32
    return %arg0, %1, %c0_i32, %c0_i32_0 : i32, i32, i32, i32
  }
  func.func @transform_2(%arg0: i32, %arg1: i32, %arg2: memref<32xi32, #tpu.memory_space<smem>>, %arg3: memref<32xi32, #tpu.memory_space<smem>>, %arg4: memref<32xi32, #tpu.memory_space<smem>>) -> (i32, i32, i32, i32) {
    %0 = arith.index_cast %arg1 : i32 to index
    %1 = memref.load %arg4[%0] : memref<32xi32, #tpu.memory_space<smem>>
    %c0_i32 = arith.constant 0 : i32
    %c0_i32_0 = arith.constant 0 : i32
    %c0_i32_1 = arith.constant 0 : i32
    return %arg0, %1, %c0_i32, %c0_i32_0 : i32, i32, i32, i32
  }
  func.func @transform_3(%arg0: i32, %arg1: i32, %arg2: memref<32xi32, #tpu.memory_space<smem>>, %arg3: memref<32xi32, #tpu.memory_space<smem>>, %arg4: memref<32xi32, #tpu.memory_space<smem>>) -> (i32, i32, i32) {
    %c0_i32 = arith.constant 0 : i32
    %c0_i32_0 = arith.constant 0 : i32
    %c0_i32_1 = arith.constant 0 : i32
    %c0_i32_2 = arith.constant 0 : i32
    return %c0_i32, %c0_i32_0, %c0_i32_1 : i32, i32, i32
  }
  func.func @transform_4(%arg0: i32, %arg1: i32, %arg2: memref<32xi32, #tpu.memory_space<smem>>, %arg3: memref<32xi32, #tpu.memory_space<smem>>, %arg4: memref<32xi32, #tpu.memory_space<smem>>) -> (i32, i32, i32, i32) {
    %c0_i32 = arith.constant 0 : i32
    %c0_i32_0 = arith.constant 0 : i32
    %c0_i32_1 = arith.constant 0 : i32
    %c0_i32_2 = arith.constant 0 : i32
    %c0_i32_3 = arith.constant 0 : i32
    return %c0_i32, %c0_i32_0, %c0_i32_1, %c0_i32_2 : i32, i32, i32, i32
  }
  func.func @transform_5(%arg0: i32, %arg1: i32, %arg2: memref<32xi32, #tpu.memory_space<smem>>, %arg3: memref<32xi32, #tpu.memory_space<smem>>, %arg4: memref<32xi32, #tpu.memory_space<smem>>) -> (i32, i32) {
    %c0_i32 = arith.constant 0 : i32
    %c0_i32_0 = arith.constant 0 : i32
    %c0_i32_1 = arith.constant 0 : i32
    return %c0_i32, %c0_i32_0 : i32, i32
  }
  func.func @transform_6(%arg0: i32, %arg1: i32, %arg2: memref<32xi32, #tpu.memory_space<smem>>, %arg3: memref<32xi32, #tpu.memory_space<smem>>, %arg4: memref<32xi32, #tpu.memory_space<smem>>) -> (i32, i32, i32, i32) {
    %c0_i32 = arith.constant 0 : i32
    %c0_i32_0 = arith.constant 0 : i32
    %c0_i32_1 = arith.constant 0 : i32
    return %arg0, %arg1, %c0_i32, %c0_i32_0 : i32, i32, i32, i32
  }
}

</mosaic_0001>

<bundles_post_ra>
// kernel: tpu_custom_call.1
= control target key start
LH: loop header
LB: loop body
LE: loop exit
PB: predicated region body
PF: predicated region fallthrough
CT: control target
= control target key end

     0   :  { %s2839_s0 = inlined_call_operand.vmem [shape: s32[32], index: 0, kind: input, shape index: {}]   ;;  %s2840_s3 = inlined_call_operand.hbm [shape: f32[2,16,4,16], index: 3, kind: input, shape index: {}]   ;;  %s2841_s4 = inlined_call_operand.hbm [shape: f32[2,16,4,16], index: 4, kind: input, shape index: {}]   ;;  %s2842_s5 = inlined_call_operand.hbm [shape: f32[2,16,4,16], index: 5, kind: input, shape index: {}]   ;;  %s2843_s6 = inlined_call_operand.hbm [shape: f32[3,16,32], index: 6, kind: input, shape index: {}]   ;;  %s2844_s7 = inlined_call_operand.hbm [shape: f32[3,3,4,4], index: 7, kind: input, shape index: {}]   ;;  %s2845_s8 = inlined_call_operand.vmem [shape: f32[4,1], index: 8, kind: input, shape index: {}]   ;;  %s2846_s9 = inlined_call_operand.hbm [shape: f32[2,32,4,32], index: 9, kind: output, shape index: {}]   ;;  %s2847_s1 = inlined_call_operand.vmem [shape: s32[32], index: 1, kind: input, shape index: {}]   ;;  %s2848_s2 = inlined_call_operand.vmem [shape: s32[32], index: 2, kind: input, shape index: {}]  }
   0x1   :  { %2877 = sst [smem:[#allocation47_spill]] %s2840_s3  ;;  %s14_s11 = sshll.u32 %s2839_s0, 4  ;;  %s15_s11 = int_to_ptr.vmem [resolvable:$true] %s14_s11 }
   0x2   :  { %2878 = sst [smem:[#allocation48_spill]] %s2841_s4  ;;  %s18_s14 = sshll.u32 %s2847_s1, 4  ;;  %s19_s14 = int_to_ptr.vmem [resolvable:$true] %s18_s14 }
   0x3   :  { %2879 = sst [smem:[#allocation49_spill]] %s2842_s5  ;;  %s1873_s15 = scalar_lea.vmem %s15_s11, 16 }
   0x4   :  { %2880 = sst [smem:[#allocation50_spill]] %s2843_s6  ;;  %p1874_p0 = scmp.ne.s32.totalorder %s15_s11, %s1873_s15 }
   0x5   :  { %2881 = sst [smem:[#allocation51_spill]] %s2844_s7  ;;  %p1878_p1 = scmp.lt.s32.totalorder %s15_s11, %s15_s11 }
   0x6   :  { %2882 = sst [smem:[#allocation52_spill]] %s2845_s8  ;;  %p1879_p2 = scmp.lt.s32.totalorder %s1873_s15, %s1873_s15 }
   0x7   :  { %2883 = sst [smem:[#allocation53_spill]] %s2846_s9 }
   0x8   :  { %p1880_p3 = por %p1879_p2, %p1878_p1 }
   0xa   :  { %p1881_p4 = pnand %p1880_p3, %p1874_p0 }
   0xc   :  { %1884 = shalt.err (!%p1881_p4)  }
   0xd   :  { %s2229_s16 = smov [#allocation3]   ;;  %s1885_s17 = scalar_lea.vmem %s19_s14, 16 }
   0xe   :  { %17 = dma.vmem_to_smem %s15_s11, 16, %s2229_s16, [#allocation2] }
   0xf   :  { %p1886_p5 = scmp.ne.s32.totalorder %s19_s14, %s1885_s17  ;;  %p1890_p6 = scmp.lt.s32.totalorder %s19_s14, %s19_s14 }
  0x10   :  { %p1891_p7 = scmp.lt.s32.totalorder %s1885_s17, %s1885_s17 }
  0x12   :  { %p1892_p8 = por %p1891_p7, %p1890_p6 }
  0x14   :  { %p1893_p9 = pnand %p1892_p8, %p1886_p5 }
  0x16   :  { %1896 = shalt.err (!%p1893_p9)  }
  0x17   :  { %s2230_s0 = smov [#allocation4]   ;;  %s22_s19 = sshll.u32 %s2848_s2, 4  ;;  %s23_s19 = int_to_ptr.vmem [resolvable:$true] %s22_s19 }
  0x18   :  { %21 = dma.vmem_to_smem %s19_s14, 16, %s2230_s0, [#allocation2] }
  0x19   :  { %s1897_s20 = scalar_lea.vmem %s23_s19, 16  ;;  %p1902_p11 = scmp.lt.s32.totalorder %s23_s19, %s23_s19 }
  0x1a   :  { %p1898_p10 = scmp.ne.s32.totalorder %s23_s19, %s1897_s20  ;;  %p1903_p12 = scmp.lt.s32.totalorder %s1897_s20, %s1897_s20 }
  0x1c   :  { %p1904_p13 = por %p1903_p12, %p1902_p11 }
  0x1e   :  { %p1905_p0 = pnand %p1904_p13, %p1898_p10 }
  0x20   :  { %1908 = shalt.err (!%p1905_p0)  }
  0x21   :  { %s2231_s21 = smov [#allocation5]  }
  0x22   :  { %25 = dma.vmem_to_smem %s23_s19, 16, %s2231_s21, [#allocation2] }
  0x23   :  { %2139 = dma.done.wait [#allocation2], 48 }
  0x24   :  { %2140 = vsyncadd [#allocation2], 4294967248 }
  0x25   :  { %27 = sfence }
  0x26   :  { %28 = vsyncpa [#allocation7], 0 }
  0x27   :  { %30 = vsyncpa [#allocation7 + $0x1], 0 }
  0x28   :  { %31 = vsyncpa [#allocation10], 0 }
  0x29   :  { %33 = vsyncpa [#allocation10 + $0x1], 0 }
  0x2a   :  { %34 = vsyncpa [#allocation13], 0 }
  0x2b   :  { %35 = vsyncpa [#allocation8], 0 }
  0x2c   :  { %37 = vsyncpa [#allocation8 + $0x1], 0  ;;  %s2304_s2 = smov 0   ;;  %s2306_s22 = smov 0  }
  0x2d   :  { %s2308_s23 = smov 0   ;;  %s2310_s24 = smov 0  }
  0x2e   :  { %s2312_s25 = smov 0   ;;  %s2314_s26 = smov 0  }
  0x2f   :  { %s2316_s27 = smov 0   ;;  %s2318_s28 = smov 0  }
  0x30   :  { %s2320_s29 = smov 0   ;;  %s2322_s30 = smov 0  }
  0x31   :  { %s2324_s10 = smov 0   ;;  %s2326_s11 = smov 0  }
  0x32   :  { %s2328_s12 = smov 0   ;;  %s2330_s13 = smov 0  }
  0x33   :  { %s2332_s14 = smov 0   ;;  %s2334_s15 = smov 0  }
  0x34   :  { %s2336_s16 = smov 0  }
  0x35 LB: > { %2884 = sst [smem:[#allocation28_spill]] %s2163_s2  ;;  %s2390_s17 = sadd.s32 4294967295, %s2227_s16   ;;  %s2227_s16 = sphi %s2336_s16, %s43_s16   ;;  %s2223_s15 = sphi %s2334_s15, %s2969_s15   ;;  %s2219_s14 = sphi %s2332_s14, %s2979_s14   ;;  %s2215_s13 = sphi %s2330_s13, %s2978_s13   ;;  %s2211_s12 = sphi %s2328_s12, %s2977_s12   ;;  %s2207_s11 = sphi %s2326_s11, %s2976_s11   ;;  %s2203_s10 = sphi %s2324_s10, %s2975_s10   ;;  %s2199_s30 = sphi %s2322_s30, %s2974_s30   ;;  %s2195_s29 = sphi %s2320_s29, %s2965_s29   ;;  %s2191_s28 = sphi %s2318_s28, %s2964_s28   ;;  %s2187_s27 = sphi %s2316_s27, %s2963_s27   ;;  %s2183_s26 = sphi %s2314_s26, %s2973_s26   ;;  %s2179_s25 = sphi %s2312_s25, %s2972_s25   ;;  %s2175_s24 = sphi %s2310_s24, %s2962_s24   ;;  %s2171_s23 = sphi %s2308_s23, %s2971_s23   ;;  %s2167_s22 = sphi %s2306_s22, %s2960_s22   ;;  %s2163_s2 = sphi %s2304_s2, %s2959_s2  }
  0x36   : > { %2885 = sst [smem:[#allocation29_spill]] %s2167_s22  ;;  %s1529_s0 = sadd.s32 4294967294, %s2227_s16  }
  0x37   : > { %2886 = sst [smem:[#allocation30_spill]] %s2171_s23  ;;  %p2863_p1 = scmp.eq.s32.totalorder %s2390_s17, 0 }
  0x38   : > { %2887 = sst [smem:[#allocation31_spill]] %s2175_s24  ;;  %p227_p2 = scmp.ne.s32.totalorder %s2171_s23, %s2167_s22 }
  0x39   : > { %2888 = sst [smem:[#allocation32_spill]] %s2179_s25  ;;  %p228_p3 = scmp.eq.s32.totalorder %s2390_s17, 63 }
  0x3a   : > { %2889 = sst [smem:[#allocation33_spill]] %s2191_s28  ;;  %p233_p4 = scmp.ne.s32.totalorder %s2167_s22, %s2163_s2 }
  0x3b   : > { %2890 = sst [smem:[#allocation34_spill]] %s2195_s29  ;;  %p234_p5 = scmp.eq.s32.totalorder %s1529_s0, 63 }
  0x3c   : > { %2891 = sst [smem:[#allocation35_spill]] %s2211_s12  ;;  %p1530_p6 = scmp.ge.s32.totalorder %s2227_s16, 1 }
  0x3d   : > { %2892 = sst [smem:[#allocation36_spill]] %s2215_s13  ;;  %p2400_p7 = por %p228_p3, %p227_p2 }
  0x3e   : > { %2893 = sst [smem:[#allocation37_spill]] %s2223_s15  ;;  %p241_p8 = scmp.lt.s32.totalorder %s2227_s16, 65 }
  0x3f   : > { %s2894_s1 = scalar_select %p2400_p7, 1, 0 }
  0x40   : > { %p2405_p9 = por %p234_p5, %p233_p4  ;;  %p2409_p10 = pnand %p1530_p6, %p241_p8 }
  0x41   : > { %2895 = sst [smem:[#allocation38_spill]] %s2894_s1  ;;  %s2232_s20 = smov [#allocation12]  }
  0x42   : > { %s2896_s18 = scalar_select %p2405_p9, 1, 0 }
  0x43   : > { %s2898_s19 = scalar_select %p2409_p10, 1, 0 }
  0x44   : > { %2897 = sst [smem:[#allocation39_spill]] %s2896_s18  ;;  %s253_s21 = sshll.u32 %s2232_s20, 4  ;;  %s254_s21 = int_to_ptr.vmem [resolvable:$true] %s253_s21 }
  0x45   : > { %2899 = sst [smem:[#allocation40_spill]] %s2898_s19  ;;  %p1691_p11 = pneg %p2409_p10 }
  0x46   : > { %p2869_p13 = scmp.lt.s32.totalorder %s2227_s16, 64  ;;  %s1920_s18 = scalar_lea.vmem %s254_s21, 768 }
  0x47   : > { %p2417_p12 = pnand %p1691_p11, %p2863_p1  ;;  %p1921_p2 = scmp.ne.s32.totalorder %s254_s21, %s1920_s18 }
  0x48   : > { %p1928_p5 = scmp.lt.s32.totalorder %s254_s21, %s254_s21  ;;  %p1929_p6 = scmp.lt.s32.totalorder %s1920_s18, %s1920_s18 }
  0x49   : > { %p1911_p0 = pneg %p2417_p12 }
  0x4a   : > { %p1930_p8 = por %p1929_p6, %p1928_p5 }
  0x4b   : > { %p1923_p3 = pnand %p1921_p2, %p1911_p0 }
  0x4d   : > { %p1924_p4 = pneg %p1923_p3 }
  0x4f   : > { %p1931_p9 = pnand %p1930_p8, %p1924_p4 }
  0x51   : > { %1934 = shalt.err (!%p1931_p9)
}
  0x52   : > { %s2233_s20 = smov 128   ;;  %s2234_s2 = smov 8  }
  0x53   : > { %s2901_s6 = sld [smem:[#allocation50_spill]]  ;;  %s52_s1 = sadd.s32 1, %s2219_s14 }
  0x54   : > { %p53_p9 = scmp.ge.s32.totalorder %s52_s1, 32  ;;  %s55_s13 = sadd.s32 1, %s2223_s15 }
  0x55   : > { %s89_s22 = sld [smem:[#allocation4 + %s2219_s14]]  ;;  %p2864_p11 = scmp.eq.s32.totalorder %s2227_s16, 0 }
  0x56   : > { %s2981_s1 = smov (%p53_p9, %s52_s1), 0  ;;  %s2983_s13 = smov (!%p53_p9, %s55_s13), %s2223_s15 }
  0x57   : > { %2902 = sst [smem:[#allocation41_spill]] %s2981_s1  ;;  %p57_p2 = scmp.ge.s32.totalorder %s2983_s13, 2 }
  0x58   : > { %s90_s8 = sld [smem:[#allocation4 + %s2981_s1]]  ;;  %s96_s9 = sadd.s32 1, %s2195_s29 }
  0x59   : > { %1694 = dma.hbm_to_vmem [thread:$0]  (!%p2417_p12), %s2901_s6, 768, %s254_s21, [#allocation13], %s2233_s20, %s2233_s20, %s2234_s2  }
  0x5a   : > { %p109_p3 = scmp.ne.s32.totalorder %s2191_s28, %s2187_s27  ;;  %s119_s2 = sld [smem:[#allocation5 + %s2219_s14]] }
  0x5b   : > { %s2985_s13 = smov (%p57_p2, %s2983_s13), 0  ;;  %p103_p4 = scmp.ne.s32.totalorder %s2195_s29, %s2191_s28 }
  0x5c   : > { %2903 = sst [smem:[#allocation42_spill]] %s2985_s13  ;;  %p2450_p5 = por %p109_p3, %p2863_p1 }
  0x5d   : > { %s2456_s20 = ssub.s32 %s2223_s15, %s2985_s13  ;;  %s120_s27 = sld [smem:[#allocation5 + %s2981_s1]] }
  0x5e   : > { %s2904_s21 = scalar_select %p2450_p5, 1, 0 }
  0x5f   : > { %s92_s18 = ssub.s32 %s89_s22, %s90_s8  ;;  %s213_s6 = ssub.s32 %s2219_s14, %s2981_s1 }
  0x60   : > { %2905 = sst [smem:[#allocation43_spill]] %s2904_s21  ;;  %s93_s12 = sor.u32 %s92_s18, %s2456_s20 }
  0x61   : > { %s214_s28 = sor.u32 %s213_s6, %s2456_s20  ;;  %p94_p6 = scmp.eq.s32.totalorder %s93_s12, 0 }
  0x62   : > { %p2465_p8 = por %p103_p4, %p2864_p11  ;;  %p215_p9 = scmp.eq.s32.totalorder %s214_s28, 0 }
  0x63   : > { %s217_s13 = sadd.s32 1, %s2171_s23  ;;  %s122_s8 = ssub.s32 %s119_s2, %s120_s27 }
  0x64   : > { %s2471_s19 = scalar_select %p94_p6, %s2195_s29, %s96_s9  }
  0x65   : > { %s2475_s18 = sor.u32 %s122_s8, %s2456_s20  ;;  %s2478_s6 = sshll.u32 %s2223_s15, 4 }
  0x66   : > { %2907 = sst [smem:[#allocation44_spill]] %s2471_s19  ;;  %s306_s12 = sand.u32 1, %s2195_s29  }
  0x67   : > { %s2482_s5 = scalar_select %p215_p9, %s2171_s23, %s217_s13  }
  0x68   : > { %s1537_s3 = sshll.u32 %s306_s12, 2  ;;  %p2488_p2 = pnand %p2869_p13, %p2465_p8 }
  0x69   : > { %2908 = sst [smem:[#allocation45_spill]] %s2482_s5  ;;  %s308_s2 = scalar_lea.vmem [#allocation9], %s1537_s3 }
  0x6a   : > { %s1676_s28 = scalar_select %p2465_p8, [#allocation4], [#allocation17] }
  0x6b   : > { %s1677_s9 = scalar_select %p2465_p8, %s2219_s14, 0 }
  0x6c   : > { %s2987_s28 = smov (!%p2869_p13, %s1676_s28), [#allocation20]  ;;  %s318_s27 = sshll.u32 %s308_s2, 4  ;;  %s2501_s27 = int_to_ptr.vmem [resolvable:$true] %s318_s27 }
  0x6d   : > { %s2989_s9 = smov (!%p2869_p13, %s1677_s9), 0  ;;  %s2235_s8 = smov [#allocation14]  }
  0x6e   : > { %s309_s13 = sld [smem:[%s2987_s28 + %s2989_s9]]  ;;  %s266_s12 = sshll.u32 %s2235_s8, 4  ;;  %s267_s12 = int_to_ptr.vmem [resolvable:$true] %s266_s12 }
  0x6f   : > { %s1946_s22 = scalar_lea.vmem %s267_s12, 576  ;;  %p1954_p9 = scmp.lt.s32.totalorder %s267_s12, %s267_s12 }
  0x70   : > { %p1947_p3 = scmp.ne.s32.totalorder %s267_s12, %s1946_s22  ;;  %p1955_p8 = scmp.lt.s32.totalorder %s1946_s22, %s1946_s22 }
  0x72   : > { %p1949_p4 = pnand %p1947_p3, %p1911_p0  ;;  %p1956_p1 = por %p1955_p8, %p1954_p9 }
  0x74   : > { %p1950_p6 = pneg %p1949_p4 }
  0x76   : > { %p1957_p11 = pnand %p1956_p1, %p1950_p6 }
  0x78   : > { %1960 = shalt.err (!%p1957_p11)
}
  0x79   : > { %s2236_s21 = smov 64   ;;  %s2237_s3 = smov 4  }
  0x7a   : > { %s2910_s7 = sld [smem:[#allocation51_spill]]  ;;  %s314_s2 = sadd.s32 %s2478_s6, %s309_s13 }
  0x7b   : > { %s1539_s8 = sshll.u32 %s314_s2, 6  ;;  %s2911_s4 = sld [smem:[#allocation48_spill]] }
  0x7c   : > { %s2516_s29 = sld [smem:[#allocation3 + %s2219_s14]]  ;;  %s2912_s5 = sand.u32 1, %s2227_s16  }
  0x7d   : > { %s2520_s23 = scalar_lea.sflag [#allocation10], %s2912_s5  ;;  %p1963_p0 = pneg %p2488_p2 }
  0x80   : > { %1697 = dma.hbm_to_vmem [thread:$0]  (!%p2417_p12), %s2910_s7, 576, %s267_s12, [#allocation13], %s2236_s21, %s2236_s21, %s2237_s3  }
  0x81   : > { %s316_s22 = scalar_lea.hbm %s2911_s4, %s1539_s8  ;;  %s1966_s13 = scalar_lea.hbm %s2911_s4, 2048 }
  0x82   : > { %s1961_s25 = scalar_lea.hbm %s316_s22, 64  ;;  %p1967_p12 = scmp.lt.s32.totalorder %s316_s22, %s2911_s4 }
  0x83   : > { %p1962_p1 = scmp.ne.s32.totalorder %s316_s22, %s1961_s25  ;;  %p1968_p4 = scmp.lt.s32.totalorder %s1966_s13, %s1961_s25 }
  0x85   : > { %p1964_p11 = pnand %p1963_p0, %p1962_p1  ;;  %p1969_p6 = por %p1968_p4, %p1967_p12 }
  0x87   : > { %p1965_p3 = pneg %p1964_p11 }
  0x89   : > { %p1970_p9 = pnand %p1969_p6, %p1965_p3 }
  0x8b   : > { %1973 = shalt.err (!%p1970_p9)
}
  0x8c   : > { %s1974_s5 = scalar_lea.vmem %s2501_s27, 64  ;;  %s2238_s15 = smov [#allocation9]  }
  0x8d   : > { %p1975_p8 = scmp.ne.s32.totalorder %s2501_s27, %s1974_s5  ;;  %s1979_s19 = sshll.u32 %s2238_s15, 4  ;;  %s1980_s19 = int_to_ptr.vmem [resolvable:$false] %s1979_s19 }
  0x8e   : > { %s1981_s3 = scalar_lea.vmem %s1980_s19, 128  ;;  %p1982_p11 = scmp.lt.s32.totalorder %s2501_s27, %s1980_s19 }
  0x8f   : > { %p1977_p13 = pnand %p1975_p8, %p1963_p0  ;;  %p1983_p7 = scmp.lt.s32.totalorder %s1981_s3, %s1974_s5 }
  0x91   : > { %p1978_p1 = pneg %p1977_p13  ;;  %p1984_p5 = por %p1983_p7, %p1982_p11 }
  0x93   : > { %p1985_p10 = pnand %p1984_p5, %p1978_p1 }
  0x95   : > { %1988 = shalt.err (!%p1985_p10)
}
  0x96   : > { %1708 = dma.hbm_to_vmem [thread:$0]  (!%p2488_p2), %s316_s22, 64, %s2501_s27, %s2520_s23  }
  0x97   : > { %p124_p7 = scmp.eq.s32.totalorder %s2475_s18, 0  ;;  %s60_s25 = sld [smem:[#allocation3 + %s2981_s1]] }
  0x98   : > { %p73_p10 = scmp.ne.s32.totalorder %s2207_s11, %s2203_s10  ;;  %p79_p13 = scmp.ne.s32.totalorder %s2203_s10, %s2199_s30 }
  0x99   : > { %s66_s24 = sadd.s32 1, %s2207_s11  ;;  %s283_s9 = sand.u32 1, %s2207_s11  }
  0x9a   : > { %p2913_p5 = scmp.eq.s32.totalorder %s2227_s16, 0  ;;  %p2915_p3 = scmp.eq.s32.totalorder %s2390_s17, 0 }
  0x9b   : > { %s2916_s27 = sld [smem:[#allocation32_spill]]  ;;  %s1534_s30 = sshll.u32 %s283_s9, 2 }
  0x9c   : > { %p2547_p0 = por %p2913_p5, %p73_p10  ;;  %p2553_p2 = por %p2915_p3, %p79_p13 }
  0x9d   : > { %p2918_p12 = scmp.lt.s32.totalorder %s2227_s16, 64  ;;  %s2920_s0 = sld [smem:[#allocation31_spill]] }
  0x9e   : > { %s2917_s8 = scalar_select %p2553_p2, 1, 0 }
  0x9f   : > { %p2561_p4 = pnand %p2918_p12, %p2547_p0  ;;  %s62_s28 = ssub.s32 %s2516_s29, %s60_s25 }
  0xa0   : > { %s63_s13 = sor.u32 %s62_s28, %s2456_s20  ;;  %s287_s12 = scalar_lea.vmem [#allocation6], %s1534_s30 }
  0xa1   : > { %s297_s21 = sshll.u32 %s287_s12, 4  ;;  %p64_p6 = scmp.eq.s32.totalorder %s63_s13, 0  ;;  %s2587_s21 = int_to_ptr.vmem [resolvable:$true] %s297_s21 }
  0xa2   : > { %s1673_s5 = scalar_select %p2547_p0, [#allocation3], [#allocation16] }
  0xa3   : > { %s2570_s15 = scalar_select %p64_p6, %s2207_s11, %s66_s24  }
  0xa4   : > { %s1674_s19 = scalar_select %p2547_p0, %s2219_s14, 0 }
  0xa5   : > { %2921 = sst [smem:[#allocation46_spill]] %s2570_s15  ;;  %p2922_p9 = pmov %p2918_p12 }
  0xa6   : > { %s126_s29 = sadd.s32 1, %s2183_s26  ;;  %p133_p1 = scmp.ne.s32.totalorder %s2183_s26, %s2916_s27 }
  0xa7   : > { %s2991_s5 = smov (!%p2922_p9, %s1673_s5), [#allocation19]  ;;  %p2923_p8 = pmov %p2922_p9 }
  0xa8   : > { %s2585_s20 = scalar_select %p124_p7, %s2183_s26, %s126_s29  }
  0xa9   : > { %s2993_s19 = smov (!%p2923_p8, %s1674_s19), 0  ;;  %p139_p11 = scmp.ne.s32.totalorder %s2916_s27, %s2920_s0 }
  0xaa   : > { %s288_s3 = sld [smem:[%s2991_s5 + %s2993_s19]]  ;;  %p2924_p10 = pmov %p2913_p5 }
  0xab   : > { %s327_s24 = sand.u32 1, %s2183_s26   ;;  %p2926_p5 = pmov %p2915_p3 }
  0xac   : > { %p2593_p13 = por %p133_p1, %p2924_p10  ;;  %s2928_s12 = sld [smem:[#allocation47_spill]] }
  0xad   : > { %p2601_p0 = por %p139_p11, %p2926_p5  ;;  %s2608_s29 = sshll.u32 %s327_s24, 2 }
  0xae   : > { %s2925_s25 = scalar_select %p2593_p13, 1, 0 }
  0xaf   : > { %s2927_s30 = scalar_select %p2601_p0, 1, 0 }
  0xb0   : > { %s293_s2 = sadd.s32 %s2478_s6, %s288_s3  ;;  %s284_s27 = scalar_lea.sflag [#allocation7], %s283_s9 }
  0xb1   : > { %s1536_s28 = sshll.u32 %s293_s2, 6  ;;  %p1991_p3 = pneg %p2561_p4 }
  0xb2   : > { %s2929_s5 = smov %s2928_s12  ;;  %s295_s19 = scalar_lea.hbm %s2928_s12, %s1536_s28 }
  0xb3   : > { %s1989_s0 = scalar_lea.hbm %s295_s19, 64  ;;  %s1994_s7 = scalar_lea.hbm %s2929_s5, 2048 }
  0xb4   : > { %p1990_p7 = scmp.ne.s32.totalorder %s295_s19, %s1989_s0  ;;  %p1995_p9 = scmp.lt.s32.totalorder %s295_s19, %s2929_s5 }
  0xb5   : > { %p1996_p8 = scmp.lt.s32.totalorder %s1994_s7, %s1989_s0 }
  0xb6   : > { %p1992_p12 = pnand %p1991_p3, %p1990_p7 }
  0xb7   : > { %p1997_p1 = por %p1996_p8, %p1995_p9 }
  0xb8   : > { %p1993_p6 = pneg %p1992_p12 }
  0xba   : > { %p1998_p11 = pnand %p1997_p1, %p1993_p6 }
  0xbc   : > { %2001 = shalt.err (!%p1998_p11)
}
  0xbd   : > { %s2002_s9 = scalar_lea.vmem %s2587_s21, 64  ;;  %s2239_s24 = smov [#allocation6]  }
  0xbe   : > { %p2003_p10 = scmp.ne.s32.totalorder %s2587_s21, %s2002_s9  ;;  %s2007_s2 = sshll.u32 %s2239_s24, 4  ;;  %s2008_s2 = int_to_ptr.vmem [resolvable:$false] %s2007_s2 }
  0xbf   : > { %s2009_s4 = scalar_lea.vmem %s2008_s2, 128  ;;  %p2010_p12 = scmp.lt.s32.totalorder %s2587_s21, %s2008_s2 }
  0xc0   : > { %p2005_p5 = pnand %p2003_p10, %p1991_p3  ;;  %p2011_p0 = scmp.lt.s32.totalorder %s2009_s4, %s2002_s9 }
  0xc2   : > { %p2006_p7 = pneg %p2005_p5  ;;  %p2012_p2 = por %p2011_p0, %p2010_p12 }
  0xc4   : > { %p2013_p13 = pnand %p2012_p2, %p2006_p7 }
  0xc6   : > { %2016 = shalt.err (!%p2013_p13)
}
  0xc7   : > { %1703 = dma.hbm_to_vmem [thread:$0]  (!%p2561_p4), %s295_s19, 64, %s2587_s21, %s284_s27  }
  0xc8   : > { %p2930_p3 = scmp.ne.s32.totalorder %s2925_s25, 0  ;;  %p2931_p0 = scmp.lt.s32.totalorder %s2227_s16, 64 }
  0xc9   : > { %s329_s28 = scalar_lea.vmem [#allocation11], %s2608_s29  ;;  %s2935_s27 = sld [smem:[#allocation49_spill]] }
  0xca   : > { %s1679_s7 = scalar_select %p2930_p3, [#allocation5], [#allocation18] }
  0xcb   : > { %s1680_s1 = scalar_select %p2930_p3, %s2219_s14, 0 }
  0xcc   : > { %s2995_s7 = smov (!%p2931_p0, %s1679_s7), [#allocation21]  ;;  %p2932_p2 = pmov %p2931_p0 }
  0xcd   : > { %p2933_p13 = pmov %p2931_p0  ;;  %s339_s13 = sshll.u32 %s329_s28, 4  ;;  %s340_s13 = int_to_ptr.vmem [resolvable:$true] %s339_s13 }
  0xce   : > { %s2997_s1 = smov (!%p2932_p2, %s1680_s1), 0 }
  0xcf   : > { %p2637_p6 = pnand %p2933_p13, %p2930_p3  ;;  %s330_s15 = sld [smem:[%s2995_s7 + %s2997_s1]] }
  0xd0   : > { %s2936_s0 = smov %s2935_s27 }
  0xd1   : > { %p2019_p9 = pneg %p2637_p6  ;;  %s2022_s2 = scalar_lea.hbm %s2936_s0, 2048 }
  0xd5   : > { %s335_s18 = sadd.s32 %s2478_s6, %s330_s15 }
  0xd6   : > { %s1542_s21 = sshll.u32 %s335_s18, 6 }
  0xd7   : > { %s337_s3 = scalar_lea.hbm %s2935_s27, %s1542_s21 }
  0xd8   : > { %s2017_s9 = scalar_lea.hbm %s337_s3, 64  ;;  %p2023_p11 = scmp.lt.s32.totalorder %s337_s3, %s2936_s0 }
  0xd9   : > { %p2018_p4 = scmp.ne.s32.totalorder %s337_s3, %s2017_s9  ;;  %p2024_p10 = scmp.lt.s32.totalorder %s2022_s2, %s2017_s9 }
  0xdb   : > { %p2020_p8 = pnand %p2019_p9, %p2018_p4  ;;  %p2025_p5 = por %p2024_p10, %p2023_p11 }
  0xdd   : > { %p2021_p1 = pneg %p2020_p8 }
  0xdf   : > { %p2026_p7 = pnand %p2025_p5, %p2021_p1 }
  0xe1   : > { %2029 = shalt.err (!%p2026_p7)
}
  0xe2   : > { %s2030_s6 = scalar_lea.vmem %s340_s13, 64  ;;  %s2240_s7 = smov [#allocation11]  }
  0xe3   : > { %p2031_p12 = scmp.ne.s32.totalorder %s340_s13, %s2030_s6  ;;  %s2035_s1 = sshll.u32 %s2240_s7, 4  ;;  %s2036_s1 = int_to_ptr.vmem [resolvable:$false] %s2035_s1 }
  0xe4   : > { %s2037_s15 = scalar_lea.vmem %s2036_s1, 128  ;;  %p2038_p2 = scmp.lt.s32.totalorder %s340_s13, %s2036_s1 }
  0xe5   : > { %p2033_p3 = pnand %p2031_p12, %p2019_p9  ;;  %p2039_p13 = scmp.lt.s32.totalorder %s2037_s15, %s2030_s6 }
  0xe7   : > { %p2034_p0 = pneg %p2033_p3  ;;  %p2040_p4 = por %p2039_p13, %p2038_p2 }
  0xe9   : > { %p2041_p8 = pnand %p2040_p4, %p2034_p0 }
  0xeb   : > { %2044 = shalt.err (!%p2041_p8)
}
  0xec   : > { %1713 = dma.hbm_to_vmem [thread:$0]  (!%p2637_p6), %s337_s3, 64, %s340_s13, %s2520_s23  }
  0xed   : > { %s2937_s28 = sld [smem:[#allocation40_spill]] }
  0xf3   : > { %p2938_p1 = scmp.ne.s32.totalorder %s2937_s28, 0 }
  0xf4   : > { %s350_s18 = sand.u32 (!%p2938_p1), 1, %s2203_s10   ;;  %p2939_p9 = scmp.ne.s32.totalorder (!%p2938_p1), %s2917_s8, 0 }
  0xf5   : > { %348 = sbr.rel (%p2938_p1) target bundleno = 1095 (0x447), region = 44  ;;  %s2660_s21 = sshll.u32 (!%p2938_p1), %s350_s18, 2 }
  0xf6   : > { %s351_s12 = scalar_lea.sflag (!%p2938_p1), [#allocation7], %s350_s18  ;;  %s354_s19 = scalar_lea.vmem (!%p2938_p1), [#allocation6], %s2660_s21 }
  0xfa   : > { %2142 = dma.done.wait (%p2939_p9), %s351_s12, 64  }
  0xfb   : > { %2144 = vsyncadd (%p2939_p9), %s351_s12, 4294967232  ;;  %s2940_s22 = sld [smem:[#allocation33_spill]]  ;;  %s359_s23 = sand.u32 1, %s2390_s17  }
  0xfc   : > { %s2941_s27 = sld [smem:[#allocation43_spill]]  ;;  %s360_s9 = scalar_lea.sflag [#allocation10], %s359_s23 }
 0x101   : > { %s361_s13 = sand.u32 1, %s2940_s22  }
 0x102   : > { %s1545_s3 = sshll.u32 %s361_s13, 2  ;;  %p2942_p6 = scmp.ne.s32.totalorder %s2941_s27, 0 }
 0x103   : > { %s363_s25 = scalar_lea.vmem [#allocation9], %s1545_s3 }
 0x104   : > { %2146 = dma.done.wait (%p2942_p6), %s360_s9, 64  }
 0x105   : > { %2148 = vsyncadd (%p2942_p6), %s360_s9, 4294967232  ;;  %s2943_s24 = sld [smem:[#allocation32_spill]]  ;;  %p2944_p11 = scmp.ne.s32.totalorder %s2927_s30, 0 }
 0x10b   : > { %s370_s2 = sand.u32 1, %s2943_s24  }
 0x10c   : > { %s1546_s4 = sshll.u32 %s370_s2, 2 }
 0x10d   : > { %s372_s29 = scalar_lea.vmem [#allocation11], %s1546_s4 }
 0x10e   : > { %2150 = dma.done.wait (%p2944_p11), %s360_s9, 64  }
 0x10f   : > { %2152 = vsyncadd (%p2944_p11), %s360_s9, 4294967232  ;;  %p2945_p10 = scmp.eq.s32.totalorder %s2390_s17, 0 }
 0x111   : > { %2154 = dma.done.wait (%p2945_p10), [#allocation13], 1344   ;;  %p2946_p5 = pmov %p2945_p10 }
 0x112   : > { %s2947_s8 = sld [smem:[#allocation35_spill]]  ;;  %v2241_v0 = vmov 0.0   ;;  %vm2242_vm0 = vmmov 0   ;;  %vm447_vm1 = vcmask 1043456   ;;  %vm443_vm2 = vcmask 31744   ;;  %v677_v11 = vld [vmem:[#allocation12 + $0x8] sm:$0xff] }
 0x113   : > { %2156 = vsyncadd (%p2946_p5), [#allocation13], 4294965952  ;;  %1603 = vmatprep.subr.mxu0 %v2241_v0  ;;  %1605 = vmatprep.mubr.msk.f32.mxu0 %vm2242_vm0, %v2241_v0  ;;  %v429_v3 = vld [vmem:[%s363_s25] sm:$0xf]  ;;  %v442_v4 = vld [vmem:[#allocation14 + $0xc] sm:$0xf] }
 0x114   : > { %1608 = vmatprep.subr.mxu1 %v2241_v0  ;;  %1610 = vmatprep.mubr.msk.f32.mxu1 %vm2242_vm0, %v2241_v0  ;;  %v426_v5 = vld [vmem:[%s354_s19] sm:$0xf]  ;;  %v430_v7 = vld [vmem:[%s372_s29] sm:$0xf]  ;;  %v440_v8 = vld [vmem:[#allocation14] sm:$0xf] }
 0x115   : > { %1604 = vmatpush3.msk.msra.mxu0 %vm447_vm1, %v429_v3  ;;  %v598_v10 = vld [vmem:[#allocation14 + $0x18] sm:$0xf]  ;;  %v676_v12 = vld [vmem:[#allocation12] sm:$0xff]  ;;  %v904_v14 = vld [vmem:[#allocation14 + $0x1c] sm:$0xf]  ;;  %s2948_s1 = sld [smem:[#allocation52_spill]] }
 0x116   : > { %1606 = vmatmul.mubr.msk.f32.vlgmr.msra.gmra.mxu0 %vm443_vm2, %v442_v4  ;;  %1613 = vmatprep.subr.mxu0 %v2241_v0  ;;  %v756_v13 = vld [vmem:[#allocation14 + $0x10] sm:$0xf]  ;;  %v2243_v16 = vmov 0   ;;  %vm678_vm3 = vcmask 130048   ;;  %v754_v25 = vld [vmem:[#allocation14 + $0x4] sm:$0xf] }
 0x117   : > { %1615 = vmatprep.mubr.msk.f32.mxu0 %vm2242_vm0, %v2241_v0  ;;  %1872 = vset.pattern.permute.xlu0 %v2243_v16  ;;  %v981_v29 = vld [vmem:[#allocation12 + $0x18] sm:$0xff]  ;;  %v980_v31 = vld [vmem:[#allocation12 + $0x10] sm:$0xff]  ;;  %v1059_v32 = vld [vmem:[#allocation14 + $0x14] sm:$0xf]  ;;  %s2949_s15 = sld [smem:[#allocation29_spill]]  ;;  %vm1359_vm4 = vcmask 257024  }
 0x118   : > { %p422_p7 = scmp.gt.s32.totalorder %s2947_s8, 0  ;;  %p424_p12 = scmp.lt.s32.totalorder %s2947_s8, 31  ;;  %v1207_v33 = vld [vmem:[#allocation14 + $0x20] sm:$0xf]  ;;  %v1057_v40 = vld [vmem:[#allocation14 + $0x8] sm:$0xf] }
 0x119   : > { %v1284_v44 = vld [vmem:[#allocation12 + $0x28] sm:$0xff]  ;;  %s2950_s28 = sld [smem:[#allocation36_spill]]  ;;  %v1283_v46 = vld [vmem:[#allocation12 + $0x20] sm:$0xff] }
 0x11a   : > { %s423_s30 = scalar_select %p422_p7, 1.0, 0.0 }
 0x11b   : > { %s425_s17 = scalar_select %p424_p12, 1.0, 0.0  ;;  %v433_v15 = vld [vmem:[%s2948_s1] sm:$0xf] }
 0x11c   : > { %v427_v1 = vstv %s423_s30  ;;  %436 = vperm.xlu0 %1872, %v433_v15   ;;  %s2951_s12 = sld [smem:[#allocation38_spill]] }
 0x11d   : > { %v431_v2 = vstv %s425_s17  ;;  %v2693_v6 = vmul.f32 %v427_v1, %v426_v5  ;;  %s416_s18 = sand.u32 1, %s2949_s15   ;;  %s2952_s25 = sld [smem:[#allocation53_spill]] }
 0x11e   : > { %v432_v9 = vmul.f32 %v431_v2, %v430_v7  ;;  %s1549_s21 = sshll.u32 %s416_s18, 2  ;;  %s1362_s2 = scalar_lea.sflag [#allocation8], %s416_s18 }
 0x11f   : > { %1609 = vmatpush3.msk.msra.mxu1 %vm447_vm1, %v2693_v6  ;;  %s1572_s19 = sshll.u32 %s2950_s28, 5  ;;  %s418_s23 = scalar_lea.vmem [#allocation15], %s1549_s21 }
 0x120   : > { %1614 = vmatpush3.msk.msra.mxu0 %vm447_vm1, %v432_v9  ;;  %1611 = vmatmul.mubr.msk.f32.vlgmr.msra.gmra.mxu1 %vm443_vm2, %v440_v8  ;;  %s1373_s22 = sadd.s32 %s2947_s8, %s1572_s19  ;;  %s1377_s13 = sshll.u32 %s418_s23, 4  ;;  %s1378_s13 = int_to_ptr.vmem [resolvable:$true] %s1377_s13 }
 0x121   : > { %1618 = vmatprep.subr.mxu1 %v2241_v0  ;;  %1625 = vmatprep.subr.mxu0 %v2241_v0  ;;  %s1573_s27 = sshll.u32 %s1373_s22, 6  ;;  %s2045_s29 = scalar_lea.vmem %s1378_s13, 64 }
 0x122   : > { %1616 = vmatmul.mubr.msk.f32.vlgmr.msra.gmra.mxu0 %vm443_vm2, %v598_v10  ;;  %1622 = vmatprep.mubr.msk.f32.mxu1 %vm2242_vm0, %v2241_v0  ;;  %p2046_p3 = scmp.ne.s32.totalorder %s1378_s13, %s2045_s29  ;;  %p2954_p0 = scmp.ne.s32.totalorder %s2951_s12, 0 }
 0x123   : > { %1626 = vmatpush3.msk.msra.mxu0 %vm447_vm1, %v429_v3  ;;  %1627 = vmatprep.mubr.msk.f32.mxu0 %vm2242_vm0, %v2241_v0  ;;  %s2953_s4 = smov %s2952_s25  ;;  %s2760_s24 = scalar_lea.hbm %s2952_s25, %s1573_s27 }
 0x124   : > { %1635 = vmatprep.subr.mxu0 %v2241_v0  ;;  %1619 = vmatpush3.msra.mxu1 %v677_v11  ;;  %p2047_p2 = pnand %p2046_p3, %p2954_p0  ;;  %s2244_s8 = smov [#allocation15]  }
 0x125   : > { %1620 = vmatprep.subr.mxu1 %v2241_v0  ;;  %s2049_s30 = sshll.u32 %s2244_s8, 4  ;;  %s2050_s30 = int_to_ptr.vmem [resolvable:$false] %s2049_s30 }
 0x126   : > { %1621 = vmatpush3.msra.mxu1 %v676_v12  ;;  %1628 = vmatmul.mubr.msk.f32.vlgmr.msra.gmra.mxu0 %vm443_vm2, %v756_v13  ;;  %p2048_p13 = pneg %p2047_p2  ;;  %s2051_s17 = scalar_lea.vmem %s2050_s30, 128 }
 0x127   : > { %1630 = vmatprep.subr.mxu1 %v2241_v0  ;;  %1636 = vmatpush3.msk.msra.mxu0 %vm447_vm1, %v432_v9  ;;  %p2052_p4 = scmp.lt.s32.totalorder %s1378_s13, %s2050_s30  ;;  %p2053_p8 = scmp.lt.s32.totalorder %s2051_s17, %s2045_s29 }
 0x128   : > { %1637 = vmatprep.mubr.msk.f32.mxu0 %vm2242_vm0, %v2241_v0  ;;  %1647 = vmatprep.subr.mxu0 %v2241_v0 }
 0x129   : > { %p2054_p1 = por %p2053_p8, %p2052_p4 }
 0x12a   : > { %1638 = vmatmul.mubr.msk.f32.vlgmr.msra.gmra.mxu0 %vm443_vm2, %v904_v14 }
 0x12b   : > { %1648 = vmatpush3.msk.msra.mxu0 %vm447_vm1, %v429_v3  ;;  %1649 = vmatprep.mubr.msk.f32.mxu0 %vm2242_vm0, %v2241_v0  ;;  %p2055_p9 = pnand %p2054_p1, %p2048_p13 }
 0x12c   : > { %1657 = vmatprep.subr.mxu0 %v2241_v0 }
 0x12e   : > { %1650 = vmatmul.mubr.msk.f32.vlgmr.msra.gmra.mxu0 %vm443_vm2, %v1059_v32 }
 0x12f   : > { %1658 = vmatpush3.msk.msra.mxu0 %vm447_vm1, %v432_v9  ;;  %1659 = vmatprep.mubr.msk.f32.mxu0 %vm2242_vm0, %v2241_v0 }
 0x132   : > { %1660 = vmatmul.mubr.msk.f32.vlgmr.msra.gmra.mxu0 %vm443_vm2, %v1207_v33 }
 0x197   : > { %v437_v47 = vpop.permute.xlu0 %436 }
 0x1d6   : > { %v517_v17 = vpop.f32.mrf.mxu0 }
 0x1d8   : > { %v1607_v18 = vpop.f32.mrf.mxu0 }
 0x1e0   : > { %v593_v19 = vpop.f32.mrf.mxu1 }
 0x1e1   : > { %v594_v20 = vadd.f32 %v593_v19, %v517_v17 }
 0x1e2   : > { %v1612_v21 = vpop.f32.mrf.mxu1  ;;  %v671_v22 = vpop.f32.mrf.mxu0 }
 0x1e3   : > { %v675_v23 = vadd.f32 %v671_v22, %v594_v20 }
 0x1e4   : > { %v1617_v24 = vpop.f32.mrf.mxu0 }
 0x1e5   : > { %1623 = vmatmul.mubr.msk.f32.vlgmr.msra.gmra.mxu1 %vm678_vm3, %v675_v23 }
 0x1e6   : > { %1631 = vmatpush3.msk.msra.mxu1 %vm447_vm1, %v2693_v6  ;;  %1632 = vmatprep.mubr.msk.f32.mxu1 %vm2242_vm0, %v2241_v0  ;;  %v826_v26 = vpop.f32.mrf.mxu0 }
 0x1e7   : > { %1640 = vmatprep.subr.mxu1 %v2241_v0 }
 0x1e8   : > { %v1629_v27 = vpop.f32.mrf.mxu0 }
 0x1e9   : > { %1633 = vmatmul.mubr.msk.f32.vlgmr.msra.gmra.mxu1 %vm443_vm2, %v754_v25 }
 0x1ea   : > { %1644 = vmatprep.mubr.msk.f32.mxu1 %vm2242_vm0, %v2241_v0  ;;  %v974_v28 = vpop.f32.mrf.mxu0  ;;  %1641 = vmatpush3.msra.mxu1 %v981_v29 }
 0x1eb   : > { %1642 = vmatprep.subr.mxu1 %v2241_v0 }
 0x1ec   : > { %v1639_v30 = vpop.f32.mrf.mxu0  ;;  %1643 = vmatpush3.msra.mxu1 %v980_v31 }
 0x1ed   : > { %1652 = vmatprep.subr.mxu1 %v2241_v0 }
 0x1ee   : > { %v1129_v41 = vpop.f32.mrf.mxu0 }
 0x1f0   : > { %v1651_v42 = vpop.f32.mrf.mxu0 }
 0x1f2   : > { %v1277_v43 = vpop.f32.mrf.mxu0 }
 0x1f4   : > { %v1661_v45 = vpop.f32.mrf.mxu0 }
 0x2a5   : > { %v748_v34 = vpop.f32.mrf.mxu1 }
 0x2a6   : > { %v752_v48 = vadd.f32 %v748_v34, %v437_v47 }
 0x2a7   : > { %v1624_v35 = vpop.f32.mrf.mxu1 }
 0x2a9   : > { %v899_v36 = vpop.f32.mrf.mxu1 }
 0x2aa   : > { %v900_v37 = vadd.f32 %v899_v36, %v826_v26 }
 0x2ab   : > { %v1634_v38 = vpop.f32.mrf.mxu1 }
 0x2ac   : > { %v978_v39 = vadd.f32 %v974_v28, %v900_v37 }
 0x2ae   : > { %1645 = vmatmul.mubr.msk.f32.vlgmr.msra.gmra.mxu1 %vm678_vm3, %v978_v39 }
 0x2af   : > { %1653 = vmatpush3.msk.msra.mxu1 %vm447_vm1, %v2693_v6  ;;  %1654 = vmatprep.mubr.msk.f32.mxu1 %vm2242_vm0, %v2241_v0 }
 0x2b0   : > { %1662 = vmatprep.subr.mxu1 %v2241_v0 }
 0x2b2   : > { %1655 = vmatmul.mubr.msk.f32.vlgmr.msra.gmra.mxu1 %vm443_vm2, %v1057_v40 }
 0x2b3   : > { %1666 = vmatprep.mubr.msk.f32.mxu1 %vm2242_vm0, %v2241_v0  ;;  %1663 = vmatpush3.msra.mxu1 %v1284_v44 }
 0x2b4   : > { %1664 = vmatprep.subr.mxu1 %v2241_v0 }
 0x2b5   : > { %1665 = vmatpush3.msra.mxu1 %v1283_v46 }
 0x36e   : > { %v1051_v49 = vpop.f32.mrf.mxu1 }
 0x36f   : > { %v1055_v50 = vadd.f32 %v1051_v49, %v752_v48 }
 0x370   : > { %v1646_v51 = vpop.f32.mrf.mxu1 }
 0x372   : > { %v1202_v52 = vpop.f32.mrf.mxu1 }
 0x373   : > { %v1203_v53 = vadd.f32 %v1202_v52, %v1129_v41 }
 0x374   : > { %v1656_v54 = vpop.f32.mrf.mxu1 }
 0x375   : > { %v1281_v55 = vadd.f32 %v1277_v43, %v1203_v53 }
 0x377   : > { %1667 = vmatmul.mubr.msk.f32.vlgmr.msra.gmra.mxu1 %vm678_vm3, %v1281_v55 }
 0x437   : > { %v1354_v56 = vpop.f32.mrf.mxu1 }
 0x438   : > { %v1358_v57 = vadd.f32 %v1354_v56, %v1055_v50 }
 0x439   : > { %v1668_v58 = vpop.f32.mrf.mxu1 }
 0x43a   : > { %1360 = vst.msk [vmem:[%s418_s23] sm:$0xf] %vm1359_vm4, %v1358_v57 }
 0x43b   : > { %2058 = shalt.err (!%p2055_p9)
}
 0x43c   : > { %s2059_s6 = scalar_lea.hbm %s2760_s24, 64  ;;  %s2063_s15 = scalar_lea.hbm %s2953_s4, 4096 }
 0x43d   : > { %p2060_p6 = scmp.ne.s32.totalorder %s2760_s24, %s2059_s6  ;;  %p2064_p5 = scmp.lt.s32.totalorder %s2760_s24, %s2953_s4 }
 0x43e   : > { %p2065_p7 = scmp.lt.s32.totalorder %s2063_s15, %s2059_s6 }
 0x43f   : > { %p2061_p11 = pnand %p2060_p6, %p2954_p0 }
 0x440   : > { %p2066_p12 = por %p2065_p7, %p2064_p5 }
 0x441   : > { %p2062_p10 = pneg %p2061_p11 }
 0x443   : > { %p2067_p3 = pnand %p2066_p12, %p2062_p10 }
 0x445   : > { %2070 = shalt.err (!%p2067_p3)
}
 0x446   : > { %1689 = dma.vmem_to_hbm [thread:$0]  (%p2954_p0), %s1378_s13, 64, %s2760_s24, %s1362_s2  }
 0x447 PF: > { %s2955_s21 = sld [smem:[#allocation28_spill]]  ;;  %p1723_p2 = scmp.ge.s32.totalorder %s2227_s16, 2 }
 0x448   : > { %s2956_s19 = sld [smem:[#allocation39_spill]] }
 0x44d   : > { %s1389_s22 = sand.u32 1, %s2955_s21  }
 0x44e   : > { %p2957_p13 = scmp.ne.s32.totalorder %s2956_s19, 0  ;;  %s1390_s27 = scalar_lea.sflag [#allocation8], %s1389_s22 }
 0x450   : > { %p1715_p4 = pnand %p1723_p2, %p2957_p13 }
 0x452   : > { %p1716_p8 = pneg %p1715_p4 }
 0x454   : > { %2158 = dma.done.wait (%p1716_p8), %s1390_s27, 64  }
 0x455   : > { %2160 = vsyncadd (%p1716_p8), %s1390_s27, 4294967232  ;;  %s43_s16 = sadd.s32 1, %s2227_s16   ;;  %s2959_s2 = sld [smem:[#allocation29_spill]] }
 0x456   : > { %p2783_p1 = scmp.ge.s32.totalorder %s43_s16, 66   ;;  %s2960_s22 = sld [smem:[#allocation30_spill]] }
 0x457   : > { %s2961_s12 = sld [smem:[#allocation45_spill]]  ;;  %s2972_s25 = smov %s2183_s26 }
 0x458   : > { %s2962_s24 = sld [smem:[#allocation32_spill]]  ;;  %s2973_s26 = smov %s2585_s20 }
 0x459   : > { %s2963_s27 = sld [smem:[#allocation33_spill]]  ;;  %s2974_s30 = smov %s2203_s10 }
 0x45a   : > { %s2964_s28 = sld [smem:[#allocation34_spill]]  ;;  %s2975_s10 = smov %s2207_s11 }
 0x45b   : > { %s2965_s29 = sld [smem:[#allocation44_spill]] }
 0x45c   : > { %s2966_s13 = sld [smem:[#allocation46_spill]] }
 0x45d   : > { %s2967_s3 = sld [smem:[#allocation37_spill]]  ;;  %s2971_s23 = smov %s2961_s12 }
 0x45e   : > { %s2968_s9 = sld [smem:[#allocation41_spill]]  ;;  %s2977_s12 = smov %s2219_s14 }
 0x45f   : > { %s2969_s15 = sld [smem:[#allocation42_spill]] }
 0x460   :  { %42 = sbr.rel (!%p2783_p1) target bundleno = 53 (0x35), region = 131 }
 0x462   : > { %s2976_s11 = smov %s2966_s13 }
 0x463   : > { %s2978_s13 = smov %s2967_s3 }
 0x464   : > { %s2979_s14 = smov %s2968_s9 }
 0x465   :  { %1395 = vsyncpa [#allocation7], 1 }
 0x466   :  { %1397 = vsyncpa [#allocation7 + $0x1], 1 }
 0x467   :  { %1398 = vsyncpa [#allocation10], 1 }
 0x468   :  { %1400 = vsyncpa [#allocation10 + $0x1], 1 }
 0x469   :  { %1401 = vsyncpa [#allocation13], 1 }
 0x46a   :  { %1402 = vsyncpa [#allocation8], 1 }
 0x46b   :  { %1404 = vsyncpa [#allocation8 + $0x1], 1 }

</bundles_post_ra>
